<compile_context>
chip_gen: v7x
topology: tpu7x:2x2x1
jax: 0.10.0
libtpu: 0.0.40
codegen_flags: <defaults>
</compile_context>

<pallas_src>
import functools
import math

import jax
import jax.numpy as jnp
import numpy as np
from jax.experimental import pallas as pl
from jax.experimental.pallas import tpu as pltpu

_LOG_2PI = math.log(2.0 * math.pi)


def _round_up(x, m):
    return (x + m - 1) // m * m


def _gac_kernel(obs_ref, w_ref, b_ref, std_ref, eps_ref, out_ref, *, A, OUT_W):
    """Fused Gaussian actor-critic head.

    obs_ref : [TB, D]      observation tile (batch-blocked)
    w_ref   : [D, A+1]     fused [Wa | Wc]        (VMEM-resident)
    b_ref   : [1, A+1]     fused [ba | bc]        (VMEM-resident)
    std_ref : [1, A]       raw std parameter (pre-softplus)
    eps_ref : [TB, A]      N(0,1) noise for dist.sample()
    out_ref : [TB, OUT_W]  packed, lane-dense output slab:
                cols [0, A)        -> action
                cols [A, 2A)       -> mean
                col  2A            -> log_pi_a
                col  2A+1          -> entropy
                col  2A+2          -> v
    """
    obs = obs_ref[...]                                    # [TB, D] f32
    TB = obs.shape[0]

    # Single fused MXU matmul for both heads.
    h = (jnp.dot(obs, w_ref[...], preferred_element_type=jnp.float32)
         + b_ref[...])                                    # [TB, A+1]
    mean = jnp.tanh(h[:, :A])                             # [TB, A]
    v = h[:, A:A + 1]                                     # [TB, 1]

    # std = softplus(std_param); batch independent.
    std_p = std_ref[...]                                  # [1, A]
    std = jnp.logaddexp(std_p, jnp.zeros_like(std_p))     # softplus
    log_std = jnp.log(std)                                # [1, A]

    # Sample: action = mean + std * eps.
    eps = eps_ref[...]                                    # [TB, A]
    action = mean + std * eps

    # log_prob of the in-kernel sample: (action-mean)^2 / var == eps^2 exactly.
    logp_el = -0.5 * (eps * eps) - log_std - 0.5 * _LOG_2PI
    logp = jnp.sum(logp_el, axis=-1, keepdims=True)       # [TB, 1]

    # Entropy summed over A (batch-independent scalar), broadcast to the tile.
    ent = jnp.sum(0.5 + 0.5 * _LOG_2PI + log_std, axis=-1, keepdims=True)
    ent_col = jnp.broadcast_to(ent, (TB, 1))              # [TB, 1]

    parts = [action, mean, logp, ent_col, v]
    pad_w = OUT_W - (2 * A + 3)
    if pad_w > 0:
        parts.append(jnp.zeros((TB, pad_w), jnp.float32))
    out_ref[...] = jnp.concatenate(parts, axis=-1)        # one lane-dense store


def gaussian_actor_critic_forward(obs, wa, ba, wc, bc, std_param, eps,
                                  *, batch_tile=None):
    """obs: [B, D]; wa: [D, A]; ba: [1, A] (or [A]); wc: [D, 1]; bc: [1, 1];
    std_param: [A]; eps: [B, A] (noise for dist.sample())."""
    obs = jnp.asarray(obs, jnp.float32)
    eps = jnp.asarray(eps, jnp.float32)
    B, D = obs.shape
    A = wa.shape[1]

    # Fuse actor + critic heads into one matmul operand / one bias row.
    w = jnp.concatenate([wa, wc], axis=1).astype(jnp.float32)          # [D, A+1]
    b = jnp.concatenate([jnp.reshape(ba, (1, A)),
                         jnp.reshape(bc, (1, 1))], axis=1).astype(jnp.float32)
    std_p = jnp.reshape(std_param, (1, A)).astype(jnp.float32)

    # Batch tile: multiple of 8 sublanes, capped so double-buffered tiles stay
    # well inside VMEM (also on v7x's 64 MiB).
    if batch_tile is None:
        batch_tile = min(512, _round_up(B, 8))
    TB = batch_tile
    B_pad = _round_up(B, TB)
    if B_pad != B:
        obs = jnp.pad(obs, ((0, B_pad - B), (0, 0)))
        eps = jnp.pad(eps, ((0, B_pad - B), (0, 0)))

    # Lane-dense packed output slab (>= 128 lanes -> unmasked full-lane stores,
    # single writeback DMA per grid step).
    OUT_W = max(128, _round_up(2 * A + 3, 128))

    kernel = functools.partial(_gac_kernel, A=A, OUT_W=OUT_W)

    packed = pl.pallas_call(
        kernel,
        out_shape=jax.ShapeDtypeStruct((B_pad, OUT_W), jnp.float32),
        grid=(B_pad // TB,),
        in_specs=[
            pl.BlockSpec((TB, D), lambda i: (i, 0)),       # obs (batch-blocked)
            pl.BlockSpec((D, A + 1), lambda i: (0, 0)),    # fused W (resident)
            pl.BlockSpec((1, A + 1), lambda i: (0, 0)),    # fused bias
            pl.BlockSpec((1, A), lambda i: (0, 0)),        # std parameter
            pl.BlockSpec((TB, A), lambda i: (i, 0)),       # eps (batch-blocked)
        ],
        out_specs=pl.BlockSpec((TB, OUT_W), lambda i: (i, 0)),
        compiler_params=pltpu.CompilerParams(
            dimension_semantics=("parallel",)),
    )(obs, w, b, std_p, eps)

    packed = packed[:B]
    action = packed[:, :A]
    mean = packed[:, A:2 * A]
    logp = packed[:, 2 * A:2 * A + 1]
    ent = packed[:, 2 * A + 1:2 * A + 2]
    v = packed[:, 2 * A + 2:2 * A + 3]
    return {'a': action, 'log_pi_a': logp, 'ent': ent, 'mean': mean, 'v': v}


def _orthogonal(key, rows, cols, scale):
    # Deterministic orthogonal init (like nn.init.orthogonal_) followed by * scale.
    n = max(rows, cols)
    m = jax.random.normal(key, (n, n), dtype=jnp.float32)
    q, r = jnp.linalg.qr(m)
    q = q * jnp.sign(jnp.diag(r))[None, :]
    return (q[:rows, :cols] * scale).astype(jnp.float32)


if __name__ == "__main__":
    # Small shapes consistent with the module: obs [batch, state_dim].
    B, STATE_DIM, ACTION_DIM = 4, 32, 8

    key = jax.random.PRNGKey(0)
    k_obs, k_wa, k_wc, k_eps = jax.random.split(key, 4)

    obs = jax.random.normal(k_obs, (B, STATE_DIM), dtype=jnp.float32)

    # fc_action: Linear(state_dim, action_dim), orthogonal * 1e-3, bias = 0.1
    # (weights stored transposed as [in, out] so the kernel does obs @ W).
    wa = _orthogonal(k_wa, STATE_DIM, ACTION_DIM, 0.001)
    ba = jnp.full((1, ACTION_DIM), 0.1, dtype=jnp.float32)

    # fc_critic: Linear(state_dim, 1), orthogonal * 1e-3, bias = 0.1
    wc = _orthogonal(k_wc, STATE_DIM, 1, 0.001)
    bc = jnp.full((1, 1), 0.1, dtype=jnp.float32)

    # std parameter: zeros(action_dim)
    std_param = jnp.zeros((ACTION_DIM,), dtype=jnp.float32)

    # Noise for dist.sample() (action=None path), deterministic.
    eps = jax.random.normal(k_eps, (B, ACTION_DIM), dtype=jnp.float32)

    out = gaussian_actor_critic_forward(obs, wa, ba, wc, bc, std_param, eps)
    out = jax.block_until_ready(out)

    # Pure-JAX reference (same math as the PyTorch module).
    mean_ref = jnp.tanh(
        jnp.dot(obs, wa, precision=jax.lax.Precision.HIGHEST) + ba)
    v_ref = jnp.dot(obs, wc, precision=jax.lax.Precision.HIGHEST) + bc
    std = jax.nn.softplus(std_param)[None, :]
    action_ref = mean_ref + std * eps
    logp_ref = jnp.sum(
        -0.5 * ((action_ref - mean_ref) / std) ** 2 - jnp.log(std)
        - 0.5 * _LOG_2PI, axis=-1, keepdims=True)
    ent_ref = jnp.broadcast_to(
        jnp.sum(0.5 + 0.5 * _LOG_2PI + jnp.log(std), axis=-1, keepdims=True),
        (B, 1))

    assert out['a'].shape == (B, ACTION_DIM)
    assert out['mean'].shape == (B, ACTION_DIM)
    assert out['log_pi_a'].shape == (B, 1)
    assert out['ent'].shape == (B, 1)
    assert out['v'].shape == (B, 1)

    np.testing.assert_allclose(np.asarray(out['mean']), np.asarray(mean_ref),
                               rtol=1e-3, atol=1e-4)
    np.testing.assert_allclose(np.asarray(out['a']), np.asarray(action_ref),
                               rtol=1e-3, atol=1e-4)
    np.testing.assert_allclose(np.asarray(out['v']), np.asarray(v_ref),
                               rtol=1e-3, atol=1e-4)
    np.testing.assert_allclose(np.asarray(out['log_pi_a']),
                               np.asarray(logp_ref), rtol=1e-3, atol=1e-4)
    np.testing.assert_allclose(np.asarray(out['ent']), np.asarray(ent_ref),
                               rtol=1e-3, atol=1e-4)

    print("KERNEL_OK")
</pallas_src>

<mosaic_0001>
module attributes {stable_mosaic.version = 11 : i64} {
  func.func @_gac_kernel(%arg0: i32, %arg1: memref<8x32xf32, #tpu.memory_space<vmem>>, %arg2: memref<32x9xf32, #tpu.memory_space<vmem>>, %arg3: memref<1x9xf32, #tpu.memory_space<vmem>>, %arg4: memref<1x8xf32, #tpu.memory_space<vmem>>, %arg5: memref<8x8xf32, #tpu.memory_space<vmem>>, %arg6: memref<8x128xf32, #tpu.memory_space<vmem>>) attributes {dimension_semantics = [#tpu.dimension_semantics<parallel>], iteration_bounds = array<i64: 1>, scalar_prefetch = 0 : i64, scratch_operands = 0 : i64, tpu.core_type = #tpu.core_type<tc>, window_params = [{transform_indices = @transform_0, window_bounds = array<i64: 8, 32>}, {pipeline_mode = #tpu.pipeline_mode<synchronous>, transform_indices = @transform_1, window_bounds = array<i64: 32, 9>}, {pipeline_mode = #tpu.pipeline_mode<synchronous>, transform_indices = @transform_2, window_bounds = array<i64: 1, 9>}, {pipeline_mode = #tpu.pipeline_mode<synchronous>, transform_indices = @transform_3, window_bounds = array<i64: 1, 8>}, {transform_indices = @transform_4, window_bounds = array<i64: 8, 8>}, {transform_indices = @transform_5, window_bounds = array<i64: 8, 128>}]} {
    %c0 = arith.constant 0 : index
    %c0_0 = arith.constant 0 : index
    %0 = vector.load %arg1[%c0, %c0_0] : memref<8x32xf32, #tpu.memory_space<vmem>>, vector<8x32xf32>
    %c0_1 = arith.constant 0 : index
    %c0_2 = arith.constant 0 : index
    %1 = vector.load %arg2[%c0_1, %c0_2] : memref<32x9xf32, #tpu.memory_space<vmem>>, vector<32x9xf32>
    %cst = arith.constant dense<0.000000e+00> : vector<8x9xf32>
    %2 = tpu.matmul %0, %1, %cst {dimension_numbers = #tpu.dot_dimension_numbers<[1], [0], [0], [1], [0, 0, 1, 1], [], []>} : vector<8x32xf32>, vector<32x9xf32>, vector<8x9xf32> -> vector<8x9xf32>
    %c0_3 = arith.constant 0 : index
    %c0_4 = arith.constant 0 : index
    %3 = vector.load %arg3[%c0_3, %c0_4] : memref<1x9xf32, #tpu.memory_space<vmem>>, vector<1x9xf32>
    %4 = vector.broadcast %3 : vector<1x9xf32> to vector<8x9xf32>
    %5 = arith.addf %2, %4 : vector<8x9xf32>
    %6 = vector.extract_strided_slice %5 {offsets = [0, 0], sizes = [8, 8], strides = [1, 1]} : vector<8x9xf32> to vector<8x8xf32>
    %7 = math.tanh %6 : vector<8x8xf32>
    %8 = vector.extract_strided_slice %5 {offsets = [0, 8], sizes = [8, 1], strides = [1, 1]} : vector<8x9xf32> to vector<8x1xf32>
    %c0_5 = arith.constant 0 : index
    %c0_6 = arith.constant 0 : index
    %9 = vector.load %arg4[%c0_5, %c0_6] : memref<1x8xf32, #tpu.memory_space<vmem>>, vector<1x8xf32>
    %cst_7 = arith.constant 0.000000e+00 : f32
    %10 = vector.broadcast %cst_7 : f32 to vector<1x8xf32>
    %11 = arith.maximumf %9, %10 : vector<1x8xf32>
    %12 = arith.subf %9, %10 : vector<1x8xf32>
    %13 = arith.cmpf one, %12, %12 : vector<1x8xf32>
    %14 = arith.addf %9, %10 : vector<1x8xf32>
    %15 = math.absf %12 : vector<1x8xf32>
    %cst_8 = arith.constant 0.000000e+00 : f32
    %16 = vector.broadcast %cst_8 : f32 to vector<1x8xf32>
    %17 = arith.subf %16, %15 : vector<1x8xf32>
    %18 = math.exp %17 : vector<1x8xf32>
    %19 = math.log1p %18 : vector<1x8xf32>
    %20 = arith.addf %11, %19 : vector<1x8xf32>
    %21 = arith.select %13, %14, %20 : vector<1x8xi1>, vector<1x8xf32>
    %22 = math.log %21 : vector<1x8xf32>
    %c0_9 = arith.constant 0 : index
    %c0_10 = arith.constant 0 : index
    %23 = vector.load %arg5[%c0_9, %c0_10] : memref<8x8xf32, #tpu.memory_space<vmem>>, vector<8x8xf32>
    %24 = vector.broadcast %21 : vector<1x8xf32> to vector<8x8xf32>
    %25 = arith.mulf %24, %23 : vector<8x8xf32>
    %26 = arith.addf %7, %25 : vector<8x8xf32>
    %27 = arith.mulf %23, %23 : vector<8x8xf32>
    %cst_11 = arith.constant -5.000000e-01 : f32
    %28 = vector.broadcast %cst_11 : f32 to vector<8x8xf32>
    %29 = arith.mulf %28, %27 : vector<8x8xf32>
    %30 = vector.broadcast %22 : vector<1x8xf32> to vector<8x8xf32>
    %31 = arith.subf %29, %30 : vector<8x8xf32>
    %cst_12 = arith.constant 0.918938517 : f32
    %32 = vector.broadcast %cst_12 : f32 to vector<8x8xf32>
    %33 = arith.subf %31, %32 : vector<8x8xf32>
    %cst_13 = arith.constant dense<0.000000e+00> : vector<8xf32>
    %34 = vector.multi_reduction <add>, %33, %cst_13 [1] : vector<8x8xf32> to vector<8xf32>
    %35 = vector.shape_cast %34 : vector<8xf32> to vector<8x1xf32>
    %cst_14 = arith.constant 1.41893852 : f32
    %36 = vector.broadcast %cst_14 : f32 to vector<1x8xf32>
    %37 = arith.addf %36, %22 : vector<1x8xf32>
    %cst_15 = arith.constant dense<0.000000e+00> : vector<1xf32>
    %38 = vector.multi_reduction <add>, %37, %cst_15 [1] : vector<1x8xf32> to vector<1xf32>
    %39 = vector.shape_cast %38 : vector<1xf32> to vector<1x1xf32>
    %40 = vector.shape_cast %39 : vector<1x1xf32> to vector<1x1xf32>
    %41 = vector.broadcast %40 : vector<1x1xf32> to vector<8x1xf32>
    %cst_16 = arith.constant 0.000000e+00 : f32
    %42 = vector.broadcast %cst_16 : f32 to vector<8x109xf32>
    %43 = tpu.concatenate %26, %7, %35, %41, %8, %42 in 1 : vector<8x8xf32>, vector<8x8xf32>, vector<8x1xf32>, vector<8x1xf32>, vector<8x1xf32>, vector<8x109xf32> -> vector<8x128xf32>
    %c0_17 = arith.constant 0 : index
    %c0_18 = arith.constant 0 : index
    %44 = vector.load %arg6[%c0_17, %c0_18] : memref<8x128xf32, #tpu.memory_space<vmem>>, vector<8x128xf32>
    tpu.vector_store %arg6[%c0_17, %c0_18], %43 {strides = array<i32>} : memref<8x128xf32, #tpu.memory_space<vmem>>, vector<8x128xf32>,
    return
  }
  func.func @transform_0(%arg0: i32) -> (i32, i32) {
    %c0_i32 = arith.constant 0 : i32
    %c0_i32_0 = arith.constant 0 : i32
    return %arg0, %c0_i32 : i32, i32
  }
  func.func @transform_1(%arg0: i32) -> (i32, i32) {
    %c0_i32 = arith.constant 0 : i32
    %c0_i32_0 = arith.constant 0 : i32
    %c0_i32_1 = arith.constant 0 : i32
    return %c0_i32, %c0_i32_0 : i32, i32
  }
  func.func @transform_2(%arg0: i32) -> (i32, i32) {
    %c0_i32 = arith.constant 0 : i32
    %c0_i32_0 = arith.constant 0 : i32
    %c0_i32_1 = arith.constant 0 : i32
    return %c0_i32, %c0_i32_0 : i32, i32
  }
  func.func @transform_3(%arg0: i32) -> (i32, i32) {
    %c0_i32 = arith.constant 0 : i32
    %c0_i32_0 = arith.constant 0 : i32
    %c0_i32_1 = arith.constant 0 : i32
    return %c0_i32, %c0_i32_0 : i32, i32
  }
  func.func @transform_4(%arg0: i32) -> (i32, i32) {
    %c0_i32 = arith.constant 0 : i32
    %c0_i32_0 = arith.constant 0 : i32
    return %arg0, %c0_i32 : i32, i32
  }
  func.func @transform_5(%arg0: i32) -> (i32, i32) {
    %c0_i32 = arith.constant 0 : i32
    %c0_i32_0 = arith.constant 0 : i32
    return %arg0, %c0_i32 : i32, i32
  }
}

</mosaic_0001>

<bundles_post_ra>
// kernel: tpu_custom_call.1
= control target key start
LH: loop header
LB: loop body
LE: loop exit
PB: predicated region body
PF: predicated region fallthrough
CT: control target
= control target key end

     0   :  { %v256_v3 = vmov 0.0|0.0   ;;  %vm257_vm0 = vmmov 0   ;;  %v258_v6 = vmov 0.0   ;;  %s330_s0 = inlined_call_operand.vmem [shape: f32[8,32], index: 0, kind: input, shape index: {}]   ;;  %s331_s1 = inlined_call_operand.vmem [shape: f32[32,9], index: 1, kind: input, shape index: {}]   ;;  %s332_s2 = inlined_call_operand.vmem [shape: f32[1,9], index: 2, kind: input, shape index: {}]   ;;  %s333_s3 = inlined_call_operand.vmem [shape: f32[1,8], index: 3, kind: input, shape index: {}]   ;;  %s334_s4 = inlined_call_operand.vmem [shape: f32[8,8], index: 4, kind: input, shape index: {}]   ;;  %s335_s5 = inlined_call_operand.hbm [shape: f32[8,128], index: 5, kind: output, shape index: {}]  }
   0x1   :  { %v22_v0 = vld [vmem:[%s331_s1] sm:$0xff]  ;;  %v23_v1 = vld [vmem:[%s331_s1 + $0x8] sm:$0xff]  ;;  %v24_v2 = vld [vmem:[%s331_s1 + $0x10] sm:$0xff]  ;;  %212 = vmatprep.subr.bf16.mxu0 %v256_v3  ;;  %209 = vmatprep.mubr.msk.f32.mxu0 %vm257_vm0, %v258_v6 }
   0x2   :  { %v213_v4 = vpack.c.bf16 %v23_v1, %v22_v0  ;;  %v25_v5 = vld [vmem:[%s331_s1 + $0x18] sm:$0xff]  ;;  %v108_v7 = vld [vmem:[%s333_s3] sm:$0x1] }
   0x3   :  { %v112_v8 = vand.u32 2147483647, %v108_v7  ;;  %v216_v9 = vpack.c.bf16 %v25_v5, %v24_v2 }
   0x4   :  { %214 = vmatpush3.bf16.msra.mxu0 %v213_v4 }
   0x5   :  { %10 = vsyncpa [#allocation3], 0  ;;  %215 = vmatprep.subr.bf16.mxu0 %v256_v3  ;;  %v113_v10 = vsub.f32 0.0, %v112_v8  ;;  %v21_v12 = vld [vmem:[%s330_s0] sm:$0xff]  ;;  %vm33_vm1 = vcmask 261120   ;;  %v131_v18 = vlaneseq  ;;  %v109_v21 = vmax.f32 %v108_v7, 0.0 }
   0x6   :  { %vm110_vm3 = vcmp.ne.f32.partialorder %v108_v7, %v108_v7  ;;  %v129_v29 = vld [vmem:[%s334_s4] sm:$0xff]  ;;  %vm153_vm4 = vcmask 57344   ;;  %vm148_vm5 = vcmask 64512   ;;  %s259_s4 = smov 8   ;;  %s260_s6 = smov 10   ;;  %vm170_vm6 = vcmask 130048  }
   0x7   :  { %v114_v11 = vmul.f32 1.442695, %v113_v10  ;;  %v132_v23 = vshrl.u32 %v131_v18, 7  ;;  %v138_v31 = vmul.f32 %v129_v29, %v129_v29  ;;  %v193_v41 = vld [vmem:[%s332_s2] ss:$0 sm:$0xff]  ;;  %vm172_vm7 = vcmask 138240  }
   0x8   :  { %217 = vmatpush3.bf16.msra.mxu0 %v216_v9  ;;  %vm174_vm8 = vcmask 146432   ;;  %s261_s2 = smov [#allocation2]   ;;  %vm176_vm9 = vcmask 154624  }
   0x9   :  { %224 = vpow2.f32 %v114_v11  ;;  %v133_v26 = vsub.s32 0, %v132_v23  ;;  %v139_v34 = vmul.f32 -0.5, %v138_v31  ;;  %s185_s7 = sshll.u32 %s261_s2, 4  ;;  %s186_s7 = int_to_ptr.vmem [resolvable:$true] %s185_s7 }
   0xa   :  { %s232_s8 = scalar_lea.vmem %s186_s7, 128  ;;  %p237_p1 = scmp.lt.s32.totalorder %s186_s7, %s186_s7 }
   0xb   :  { %210 = vmatmul.mubr.msk.f32.vlgmr.msra.gmra.mrb[0].mxu0 %vm33_vm1, %v21_v12  ;;  %p233_p0 = scmp.ne.s32.totalorder %s186_s7, %s232_s8  ;;  %p238_p2 = scmp.lt.s32.totalorder %s232_s8, %s232_s8 }
   0xd   :  { %p239_p3 = por %p238_p2, %p237_p1 }
   0xf   :  { %p240_p4 = pnand %p239_p3, %p233_p0 }
  0x13   :  { %v225_v13 = vpop.eup %224 }
  0x14   :  { %v116_v14 = vadd.f32 1.0, %v225_v13  ;;  %v119_v15 = vmul.f32 -0.5, %v225_v13  ;;  %v122_v17 = vand.u32 2147483647, %v225_v13 }
  0x16   :  { %226 = vlog2.f32 %v116_v14  ;;  %v120_v16 = vadd.f32 1.0, %v119_v15  ;;  %vm123_vm2 = vcmp.lt.f32.partialorder %v122_v17, 0.0004427343 }
  0x18   :  { %v121_v19 = vmul.f32 %v225_v13, %v120_v16 }
  0x20   :  { %v227_v20 = vpop.eup %226 }
  0x21   :  { %v118_v22 = vmul.f32 0.6931472, %v227_v20 }
  0x23   :  { %v124_v24 = vsel %vm123_vm2, %v121_v19, %v118_v22 }
  0x24   :  { %v125_v25 = vadd.f32 %v124_v24, %v109_v21 }
  0x26   :  { %v126_v27 = vsel %vm110_vm3, %v108_v7, %v125_v25 }
  0x27   :  { %228 = vlog2.f32 %v126_v27  ;;  %v134_v28 = vrot.slane %v126_v27, %v133_v26 }
  0x29   :  { %v136_v30 = vmul.f32 %v134_v28, %v129_v29 }
  0x31   :  { %v229_v32 = vpop.eup %228 }
  0x32   :  { %v128_v33 = vmul.f32 0.6931472, %v229_v32 }
  0x34   :  { %v152_v35 = vadd.f32 1.4189385, %v128_v33  ;;  %v144_v36 = vrot.slane %v128_v33, %v133_v26 }
  0x36   :  { %v154_v37 = vsel %vm153_vm4, %v152_v35, 0.0  ;;  %v146_v38 = vsub.f32 %v139_v34, %v144_v36 }
  0x37   :  { %155 = vadd.xlane.f32.xlu0 %v154_v37 }
  0x38   :  { %v195_v39 = vadd.f32 -0.9189385, %v146_v38 }
  0x3a   :  { %v149_v40 = vsel %vm148_vm5, %v195_v39, 0.0 }
  0x3b   :  { %150 = vadd.xlane.f32.xlu0 %v149_v40 }
  0xc4   :  { %v156_v47 = vpop.xlane.xlu0 %155 }
  0xc5   :  { %v160_v50 = vrot.slane %v156_v47, %v133_v26 }
  0xc8   :  { %v151_v48 = vpop.xlane.xlu0 %150 }
  0xde   :  { %v103_v42 = vpop.f32.mrb[0].mxu0 }
  0xdf   :  { %v104_v43 = vadd.f32 %v193_v41, %v103_v42  ;;  %v211_v44 = vpop.f32.mrb[1].mxu0 }
  0xe1   :  { %230 = vtanh.f32 %v104_v43 }
  0xeb   :  { %v231_v45 = vpop.eup %230 }
  0xec   :  { %162 = vrot.lane.b32.xlu1 %v231_v45, %s259_s4  ;;  %v137_v46 = vadd.f32 %v231_v45, %v136_v30 }
  0xf0   :  { %166 = vrot.lane.b32.xlu1 %v104_v43, %s260_s6 }
 0x15e   :  { %v163_v49 = vpop.permute.xlu1 %162 }
 0x15f   :  { %v169_v51 = vsel %vm148_vm5, %v137_v46, %v163_v49 }
 0x160   :  { %v171_v52 = vsel %vm170_vm6, %v169_v51, %v151_v48 }
 0x161   :  { %v173_v53 = vsel %vm172_vm7, %v171_v52, %v160_v50 }
 0x162   :  { %v167_v54 = vpop.permute.xlu1 %166 }
 0x163   :  { %v175_v55 = vsel %vm174_vm8, %v173_v53, %v167_v54 }
 0x164   :  { %v177_v56 = vsel %vm176_vm9, %v175_v55, 0.0 }
 0x165   :  { %178 = vst [vmem:[#allocation2] sm:$0xff] %v177_v56 }
 0x166   :  { %243 = shalt.err (!%p240_p4)
}
 0x167   :  { %s244_s11 = scalar_lea.hbm %s335_s5, 128 }
 0x168   :  { %p245_p5 = scmp.ne.s32.totalorder %s335_s5, %s244_s11  ;;  %p248_p6 = scmp.lt.u32.totalorder %s244_s11, %s335_s5 }
 0x16a   :  { %p250_p7 = pnand %p248_p6, %p245_p5 }
 0x16c   :  { %253 = shalt.err (!%p250_p7)
}
 0x16d   :  { %188 = dma.vmem_to_hbm [thread:$0]  %s186_s7, 128, %s335_s5, [#allocation3]  }
 0x16e   :  { %254 = dma.done.wait [#allocation3], 128  }
 0x16f   :  { %255 = vsyncadd [#allocation3], 4294967168 }
 0x170   :  { %192 = vsyncpa [#allocation3], 1 }

</bundles_post_ra>
